<compile_context>
chip_gen: v7x
topology: tpu7x:2x2x1
jax: 0.10.0
libtpu: 0.0.40
codegen_flags: <defaults>
</compile_context>

<pallas_src>
import functools

import jax
import jax.numpy as jnp
from jax.experimental import pallas as pl
from jax.experimental.pallas import tpu as pltpu


_LANE = 128
_BN_CAP = 8                              # max batch elements fused per grid step
_TN_CAP = 131072                         # max spatial columns per grid step
_VMEM_TILE_BUDGET = 24 * 1024 * 1024     # bytes allowed for double-buffered tiles
_VMEM_LIMIT_BYTES = 32 * 1024 * 1024     # scoped VMEM limit requested from Mosaic


def _detection_head_kernel(x_ref, w_ref, b_ref, cls_ref, box_ref, obj_ref,
                           *, num_classes, bn):
    # x_ref:   (bn, C, tn)          w_ref: (C_out, C)     b_ref: (C_out, 1)
    # cls_ref: (bn, num_classes, tn) box_ref: (bn, 4, tn) obj_ref: (bn, 1, tn)
    obj_start = num_classes + 4
    w = w_ref[...]
    bias = b_ref[...]
    # bn is a small static constant -> unrolled loop of 2-D MXU matmuls; keeps the
    # spatial axis on lanes for every load/store (no in-kernel transposes).
    for b in range(bn):
        y = jnp.dot(w, x_ref[b], preferred_element_type=jnp.float32) + bias
        cls_ref[b] = y[:num_classes, :].astype(cls_ref.dtype)
        box_ref[b] = y[num_classes:obj_start, :].astype(box_ref.dtype)
        obj_ref[b] = jax.nn.sigmoid(y[obj_start:, :]).astype(obj_ref.dtype)


def fuse_detection_head_params(w_cls, b_cls, w_box, b_box, w_obj, b_obj):
    """Fuse the three PyTorch-Conv3d (C_out, C_in, 1, 1, 1) heads into one
    (C_out_total, C_in) weight and (C_out_total, 1) bias.  Call once, outside the
    per-forward path."""
    c_in = w_cls.shape[1]
    w_fused = jnp.concatenate(
        [w_cls.reshape(-1, c_in), w_box.reshape(-1, c_in), w_obj.reshape(-1, c_in)],
        axis=0)                                           # (C_out_total, C_in)
    b_fused = jnp.concatenate([b_cls, b_box, b_obj], axis=0).reshape(-1, 1)
    return w_fused, b_fused


def _choose_tiles(N, dhw, C, c_out, in_itemsize, out_itemsize):
    """Pick (bn, tn) from a VMEM budget: double-buffered footprint per step is
    2 * bn * tn * (C*in_itemsize + c_out*out_itemsize)."""
    bytes_per_col = 2 * (C * in_itemsize + c_out * out_itemsize)
    cols_cap = max(_LANE, _VMEM_TILE_BUDGET // bytes_per_col)
    target_cols = min(cols_cap, _TN_CAP)

    if dhw >= target_cols:
        # Large-volume regime: one batch element per step, big lane-dense tile.
        bn = 1
        tn = max(_LANE, (target_cols // _LANE) * _LANE)
    else:
        # Small-volume regime: full spatial extent per step, amortize across batches.
        tn = dhw
        bn = int(min(N, _BN_CAP, max(1, target_cols // max(dhw, 1))))

    # Keep at least two grid steps when there is enough work, so both v7x
    # TensorCores get a share of the DMA load (harmless on v5e/v6e).
    if pl.cdiv(N, bn) * pl.cdiv(dhw, tn) < 2:
        if N >= 2:
            bn = (N + 1) // 2
        elif dhw > 2 * _LANE:
            tn = ((dhw // 2 + _LANE - 1) // _LANE) * _LANE
    return bn, tn


def detection_head_forward(x, w_fused, b_fused, *, num_classes=5, out_dtype=None):
    """x: (N, C, D, H, W).  w_fused: (num_classes+4+1, C), b_fused: (num_classes+4+1, 1).
    Returns (cls_scores, box_pred, obj_scores) in NCDHW layout."""
    N, C, D, H, W = x.shape
    c_out = w_fused.shape[0]
    assert c_out == num_classes + 4 + 1
    if out_dtype is None:
        out_dtype = x.dtype
    out_dtype = jnp.dtype(out_dtype)

    dhw = D * H * W
    x3 = x.reshape(N, C, dhw)            # free reshape, no transpose / no pad

    bn, tn = _choose_tiles(N, dhw, C, c_out,
                           jnp.dtype(x.dtype).itemsize, out_dtype.itemsize)
    grid = (pl.cdiv(N, bn), pl.cdiv(dhw, tn))

    kernel = functools.partial(_detection_head_kernel,
                               num_classes=num_classes, bn=bn)

    cost = pl.CostEstimate(
        flops=2 * c_out * C * N * dhw,
        transcendentals=N * dhw,  # sigmoid exp per voxel
        bytes_accessed=(N * dhw * (C * jnp.dtype(x.dtype).itemsize
                                   + c_out * out_dtype.itemsize)
                        + w_fused.size * jnp.dtype(w_fused.dtype).itemsize
                        + b_fused.size * jnp.dtype(b_fused.dtype).itemsize),
    )

    cls3, box3, obj3 = pl.pallas_call(
        kernel,
        out_shape=(
            jax.ShapeDtypeStruct((N, num_classes, dhw), out_dtype),
            jax.ShapeDtypeStruct((N, 4, dhw), out_dtype),
            jax.ShapeDtypeStruct((N, 1, dhw), out_dtype),
        ),
        grid=grid,
        in_specs=[
            pl.BlockSpec((bn, C, tn), lambda i, j: (i, 0, j)),
            pl.BlockSpec((c_out, C), lambda i, j: (0, 0)),   # weights stay resident
            pl.BlockSpec((c_out, 1), lambda i, j: (0, 0)),   # bias stays resident
        ],
        out_specs=(
            pl.BlockSpec((bn, num_classes, tn), lambda i, j: (i, 0, j)),
            pl.BlockSpec((bn, 4, tn), lambda i, j: (i, 0, j)),
            pl.BlockSpec((bn, 1, tn), lambda i, j: (i, 0, j)),
        ),
        compiler_params=pltpu.CompilerParams(
            dimension_semantics=("parallel", "parallel"),
            vmem_limit_bytes=_VMEM_LIMIT_BYTES),
        cost_estimate=cost,
    )(x3, w_fused, b_fused)

    cls_scores = cls3.reshape(N, num_classes, D, H, W)
    box_pred = box3.reshape(N, 4, D, H, W)
    obj_scores = obj3.reshape(N, 1, D, H, W)
    return cls_scores, box_pred, obj_scores


def _reference_forward(x, w_cls, b_cls, w_box, b_box, w_obj, b_obj):
    # plain-JAX reference (1x1x1 conv == einsum over channels)
    def conv1(x, w, b):
        w2 = w.reshape(w.shape[0], w.shape[1])  # (C_out, C_in)
        return jnp.einsum('ncdhw,oc->nodhw', x, w2) + b[None, :, None, None, None]
    cls_scores = conv1(x, w_cls, b_cls)
    box_pred = conv1(x, w_box, b_box)
    obj_scores = jax.nn.sigmoid(conv1(x, w_obj, b_obj))
    return cls_scores, box_pred, obj_scores


if __name__ == "__main__":
    key = jax.random.PRNGKey(0)
    in_channels = 4
    num_classes = 5
    N, D, H, W = 2, 4, 8, 8  # small 3-D volume; DHW = 256 per batch element

    keys = jax.random.split(key, 7)
    x = jax.random.normal(keys[0], (N, in_channels, D, H, W), dtype=jnp.float32)

    # PyTorch-Conv3d shaped parameters: (C_out, C_in, 1, 1, 1) and (C_out,)
    w_cls = jax.random.normal(keys[1], (num_classes, in_channels, 1, 1, 1), jnp.float32) * 0.1
    b_cls = jax.random.normal(keys[2], (num_classes,), jnp.float32) * 0.1
    w_box = jax.random.normal(keys[3], (4, in_channels, 1, 1, 1), jnp.float32) * 0.1
    b_box = jax.random.normal(keys[4], (4,), jnp.float32) * 0.1
    w_obj = jax.random.normal(keys[5], (1, in_channels, 1, 1, 1), jnp.float32) * 0.1
    b_obj = jax.random.normal(keys[6], (1,), jnp.float32) * 0.1

    # One-time parameter fusion (hoisted out of the forward path).
    w_fused, b_fused = fuse_detection_head_params(
        w_cls, b_cls, w_box, b_box, w_obj, b_obj)

    cls_scores, box_pred, obj_scores = detection_head_forward(
        x, w_fused, b_fused, num_classes=num_classes)
    jax.block_until_ready((cls_scores, box_pred, obj_scores))

    # sanity check against a pure-JAX reference
    ref = _reference_forward(x, w_cls, b_cls, w_box, b_box, w_obj, b_obj)
    for got, want in zip((cls_scores, box_pred, obj_scores), ref):
        assert got.shape == want.shape
        assert jnp.allclose(got, want, atol=1e-5, rtol=1e-5)

    print("KERNEL_OK")
</pallas_src>

<mosaic_0001>
module attributes {stable_mosaic.version = 11 : i64} {
  func.func @_detection_head_kernel(%arg0: i32, %arg1: i32, %arg2: memref<1x4x256xf32, #tpu.memory_space<vmem>>, %arg3: memref<10x4xf32, #tpu.memory_space<vmem>>, %arg4: memref<10x1xf32, #tpu.memory_space<vmem>>, %arg5: memref<1x5x256xf32, #tpu.memory_space<vmem>>, %arg6: memref<1x4x256xf32, #tpu.memory_space<vmem>>, %arg7: memref<1x1x256xf32, #tpu.memory_space<vmem>>) attributes {dimension_semantics = [#tpu.dimension_semantics<parallel>, #tpu.dimension_semantics<parallel>], iteration_bounds = array<i64: 2, 1>, scalar_prefetch = 0 : i64, scratch_operands = 0 : i64, tpu.core_type = #tpu.core_type<tc>, window_params = [{transform_indices = @transform_0, window_bounds = array<i64: 1, 4, 256>}, {pipeline_mode = #tpu.pipeline_mode<synchronous>, transform_indices = @transform_1, window_bounds = array<i64: 10, 4>}, {pipeline_mode = #tpu.pipeline_mode<synchronous>, transform_indices = @transform_2, window_bounds = array<i64: 10, 1>}, {transform_indices = @transform_3, window_bounds = array<i64: 1, 5, 256>}, {transform_indices = @transform_4, window_bounds = array<i64: 1, 4, 256>}, {transform_indices = @transform_5, window_bounds = array<i64: 1, 1, 256>}]} {
    %c0 = arith.constant 0 : index
    %c0_0 = arith.constant 0 : index
    %0 = vector.load %arg3[%c0, %c0_0] : memref<10x4xf32, #tpu.memory_space<vmem>>, vector<10x4xf32>
    %c0_1 = arith.constant 0 : index
    %c0_2 = arith.constant 0 : index
    %1 = vector.load %arg4[%c0_1, %c0_2] : memref<10x1xf32, #tpu.memory_space<vmem>>, vector<10x1xf32>
    %c0_3 = arith.constant 0 : index
    %c0_4 = arith.constant 0 : index
    %c0_5 = arith.constant 0 : index
    %2 = vector.load %arg2[%c0_3, %c0_4, %c0_5] : memref<1x4x256xf32, #tpu.memory_space<vmem>>, vector<1x4x256xf32>
    %3 = vector.shape_cast %2 : vector<1x4x256xf32> to vector<4x256xf32>
    %cst = arith.constant dense<0.000000e+00> : vector<10x256xf32>
    %4 = tpu.matmul %0, %3, %cst {dimension_numbers = #tpu.dot_dimension_numbers<[1], [0], [0], [1], [0, 0, 1, 1], [], []>} : vector<10x4xf32>, vector<4x256xf32>, vector<10x256xf32> -> vector<10x256xf32>
    %5 = vector.broadcast %1 : vector<10x1xf32> to vector<10x256xf32>
    %6 = arith.addf %4, %5 : vector<10x256xf32>
    %7 = vector.extract_strided_slice %6 {offsets = [0, 0], sizes = [5, 256], strides = [1, 1]} : vector<10x256xf32> to vector<5x256xf32>
    %c0_6 = arith.constant 0 : index
    %c0_7 = arith.constant 0 : index
    %c0_8 = arith.constant 0 : index
    %8 = vector.load %arg5[%c0_6, %c0_7, %c0_8] : memref<1x5x256xf32, #tpu.memory_space<vmem>>, vector<1x5x256xf32>
    %9 = vector.shape_cast %8 : vector<1x5x256xf32> to vector<5x256xf32>
    %10 = vector.shape_cast %7 : vector<5x256xf32> to vector<1x5x256xf32>
    tpu.vector_store %arg5[%c0_6, %c0_7, %c0_8], %10 {strides = array<i32>} : memref<1x5x256xf32, #tpu.memory_space<vmem>>, vector<1x5x256xf32>,
    %11 = vector.extract_strided_slice %6 {offsets = [5, 0], sizes = [4, 256], strides = [1, 1]} : vector<10x256xf32> to vector<4x256xf32>
    %c0_9 = arith.constant 0 : index
    %c0_10 = arith.constant 0 : index
    %c0_11 = arith.constant 0 : index
    %12 = vector.load %arg6[%c0_9, %c0_10, %c0_11] : memref<1x4x256xf32, #tpu.memory_space<vmem>>, vector<1x4x256xf32>
    %13 = vector.shape_cast %12 : vector<1x4x256xf32> to vector<4x256xf32>
    %14 = vector.shape_cast %11 : vector<4x256xf32> to vector<1x4x256xf32>
    tpu.vector_store %arg6[%c0_9, %c0_10, %c0_11], %14 {strides = array<i32>} : memref<1x4x256xf32, #tpu.memory_space<vmem>>, vector<1x4x256xf32>,
    %15 = vector.extract_strided_slice %6 {offsets = [9, 0], sizes = [1, 256], strides = [1, 1]} : vector<10x256xf32> to vector<1x256xf32>
    %16 = arith.negf %15 : vector<1x256xf32>
    %17 = math.exp %16 : vector<1x256xf32>
    %cst_12 = arith.constant 1.000000e+00 : f32
    %18 = vector.broadcast %cst_12 : f32 to vector<1x256xf32>
    %19 = arith.addf %18, %17 : vector<1x256xf32>
    %20 = arith.divf %18, %19 : vector<1x256xf32>
    %c0_13 = arith.constant 0 : index
    %c0_14 = arith.constant 0 : index
    %c0_15 = arith.constant 0 : index
    %21 = vector.load %arg7[%c0_13, %c0_14, %c0_15] : memref<1x1x256xf32, #tpu.memory_space<vmem>>, vector<1x1x256xf32>
    %22 = vector.shape_cast %21 : vector<1x1x256xf32> to vector<1x256xf32>
    %23 = vector.shape_cast %20 : vector<1x256xf32> to vector<1x1x256xf32>
    tpu.vector_store %arg7[%c0_13, %c0_14, %c0_15], %23 {strides = array<i32>} : memref<1x1x256xf32, #tpu.memory_space<vmem>>, vector<1x1x256xf32>,
    return
  }
  func.func @transform_0(%arg0: i32, %arg1: i32) -> (i32, i32, i32) {
    %c0_i32 = arith.constant 0 : i32
    %c0_i32_0 = arith.constant 0 : i32
    return %arg0, %c0_i32, %arg1 : i32, i32, i32
  }
  func.func @transform_1(%arg0: i32, %arg1: i32) -> (i32, i32) {
    %c0_i32 = arith.constant 0 : i32
    %c0_i32_0 = arith.constant 0 : i32
    %c0_i32_1 = arith.constant 0 : i32
    return %c0_i32, %c0_i32_0 : i32, i32
  }
  func.func @transform_2(%arg0: i32, %arg1: i32) -> (i32, i32) {
    %c0_i32 = arith.constant 0 : i32
    %c0_i32_0 = arith.constant 0 : i32
    %c0_i32_1 = arith.constant 0 : i32
    return %c0_i32, %c0_i32_0 : i32, i32
  }
  func.func @transform_3(%arg0: i32, %arg1: i32) -> (i32, i32, i32) {
    %c0_i32 = arith.constant 0 : i32
    %c0_i32_0 = arith.constant 0 : i32
    return %arg0, %c0_i32, %arg1 : i32, i32, i32
  }
  func.func @transform_4(%arg0: i32, %arg1: i32) -> (i32, i32, i32) {
    %c0_i32 = arith.constant 0 : i32
    %c0_i32_0 = arith.constant 0 : i32
    return %arg0, %c0_i32, %arg1 : i32, i32, i32
  }
  func.func @transform_5(%arg0: i32, %arg1: i32) -> (i32, i32, i32) {
    %c0_i32 = arith.constant 0 : i32
    %c0_i32_0 = arith.constant 0 : i32
    return %arg0, %c0_i32, %arg1 : i32, i32, i32
  }
}

</mosaic_0001>

<bundles_post_ra>
// kernel: tpu_custom_call.1
= control target key start
LH: loop header
LB: loop body
LE: loop exit
PB: predicated region body
PF: predicated region fallthrough
CT: control target
= control target key end

     0   :  { %11 = vsyncpa [#allocation3], 0  ;;  %s1063_s0 = inlined_call_operand.vmem [shape: f32[2,4,256], index: 0, kind: input, shape index: {}]   ;;  %s1064_s1 = inlined_call_operand.vmem [shape: f32[10,4], index: 1, kind: input, shape index: {}]   ;;  %s1065_s2 = inlined_call_operand.vmem [shape: f32[10,1], index: 2, kind: input, shape index: {}]   ;;  %s1066_s3 = inlined_call_operand.vmem [shape: f32[2,5,256], index: 3, kind: output, shape index: {0}]   ;;  %s1067_s4 = inlined_call_operand.hbm [shape: f32[2,4,256], index: 4, kind: output, shape index: {1}]   ;;  %s1068_s5 = inlined_call_operand.hbm [shape: f32[2,1,256], index: 5, kind: output, shape index: {2}]  }
   0x1   :  { %13 = vsyncpa [#allocation3 + $0x1], 0 }
   0x2   :  { %14 = vsyncpa [#allocation5], 0 }
   0x3   :  { %16 = vsyncpa [#allocation5 + $0x1], 0  ;;  %s901_s18 = smov 0   ;;  %s903_s19 = smov 0  }
   0x4   :  { %s905_s20 = smov 0   ;;  %s907_s21 = smov 0  }
   0x5   :  { %s909_s22 = smov 0   ;;  %s911_s23 = smov 0  }
   0x6 LB: > { %s649_s24 = sadd.s32 4294967295, %s864_s23   ;;  %s650_s25 = sadd.s32 4294967294, %s864_s23   ;;  %s864_s23 = sphi %s911_s23, %s22_s23   ;;  %s860_s22 = sphi %s909_s22, %s1075_s22   ;;  %s856_s21 = sphi %s907_s21, %s1074_s21   ;;  %s852_s20 = sphi %s905_s20, %s1073_s20   ;;  %s848_s19 = sphi %s903_s19, %s1072_s19   ;;  %s844_s18 = sphi %s901_s18, %s1071_s18  }
   0x7   : > { %s34_s26 = sadd.s32 1, %s860_s22  ;;  %s141_s27 = sadd.s32 1, %s852_s20 }
   0x8   : > { %p36_p0 = scmp.ge.s32.totalorder %s34_s26, 2  ;;  %p151_p1 = scmp.ne.s32.totalorder %s852_s20, %s848_s19 }
   0x9   : > { %p152_p2 = scmp.eq.s32.totalorder %s649_s24, 1  ;;  %p157_p3 = scmp.ne.s32.totalorder %s848_s19, %s844_s18 }
   0xa   : > { %s1077_s26 = smov (%p36_p0, %s34_s26), 0  ;;  %p158_p5 = scmp.eq.s32.totalorder %s650_s25, 1 }
   0xb   : > { %p941_p4 = por %p152_p2, %p151_p1  ;;  %s136_s29 = ssub.s32 %s860_s22, %s1077_s26 }
   0xc   : > { %p653_p6 = scmp.ge.s32.totalorder %s864_s23, 1  ;;  %p139_p7 = scmp.eq.s32.totalorder %s136_s29, 0 }
   0xd   : > { %p948_p8 = por %p158_p5, %p157_p3  ;;  %p223_p9 = scmp.lt.s32.totalorder %s864_s23, 3 }
   0xe   : > { %s954_s6 = scalar_select %p139_p7, %s852_s20, %s141_s27  }
   0xf   : > { %p224_p10 = pnand %p653_p6, %p223_p9 }
  0x10   : > { %p270_p11 = scmp.lt.s32.totalorder (!%p224_p10), %s856_s21, 1  ;;  %v866_v0 = vmov (!%p224_p10), 0.0   ;;  %v294_v1 = vld [vmem:[%s1065_s2 + $0x8] sm:$0x3] (!%p224_p10)  ;;  %v867_v2 = vmov (!%p224_p10), 0   ;;  %v293_v3 = vld [vmem:[%s1065_s2] sm:$0xff] (!%p224_p10) }
  0x11   : > { %227 = sbr.rel (%p224_p10) target bundleno = 303 (0x12f), region = 32  ;;  %384 = vmatprep.mubr.f32.mxu0 (!%p224_p10), %v866_v0  ;;  %390 = vmatprep.mubr.f32.mxu1 (!%p224_p10), %v866_v0  ;;  %vm315_vm0 = vcmask (!%p224_p10), 1043456   ;;  %v291_v6 = vld [vmem:[%s1064_s1] sm:$0xff] (!%p224_p10)  ;;  %vm308_vm1 = vcmask (!%p224_p10), 31744   ;;  %v292_v7 = vld [vmem:[%s1064_s1 + $0x8] sm:$0x3] (!%p224_p10) }
  0x12   : > { %744 = vset.pattern.permute.xlu0 (!%p224_p10), %v867_v2  ;;  %s974_s29 = sand.u32 (!%p224_p10), 1, %s848_s19   ;;  %vm405_vm2 = vcmask (!%p224_p10), 1042432   ;;  %vm406_vm3 = vcmask (!%p224_p10), 1046532   ;;  %s868_s25 = smov (!%p224_p10), [#allocation2]  }
  0x13   : > { %303 = vperm.xlu0 (!%p224_p10), %744, %v294_v1   ;;  %s654_s11 = sshll.u32 (!%p224_p10), %s974_s29, 3  ;;  %vm407_vm4 = vmor (!%p224_p10), %vm405_vm2, %vm406_vm3  ;;  %s460_s17 = scalar_lea.sflag (!%p224_p10), [#allocation3], %s974_s29 }
  0x14   : > { %s261_s12 = scalar_lea.vmem (!%p224_p10), [#allocation2], %s654_s11 }
  0x15   : > { %s485_s13 = sshll.u32 (!%p224_p10), %s261_s12, 4  ;;  %s986_s13 = int_to_ptr.vmem [resolvable:$true] %s485_s13 }
  0x16   : > { %s754_s24 = scalar_lea.vmem (!%p224_p10), %s986_s13, 128 }
  0x17   : > { %298 = vperm.xlu0 (!%p224_p10), %744, %v293_v3   ;;  %p755_p12 = scmp.ne.s32.totalorder (!%p224_p10), %s986_s13, %s754_s24 }
  0x18   : > { %s271_s9 = scalar_select %p270_p11, %s856_s21, 1 }
  0x19   : > { %p756_p13 = pnand %p755_p12, %p941_p4 }
  0x1a   : > { %s675_s10 = sshll.u32 %s271_s9, 3  ;;  %s676_s27 = sshll.u32 %s271_s9, 4 }
  0x1b   : > { %s277_s15 = scalar_lea.vmem %s1063_s0, %s675_s10  ;;  %s287_s10 = scalar_lea.vmem %s1066_s3, %s676_s27 }
  0x1c   : > { %v295_v4 = vld [vmem:[%s277_s15] sm:$0xff]  ;;  %s677_s9 = sshll.u32 %s856_s21, 7  ;;  %p757_p0 = pneg %p756_p13 }
  0x1d   : > { %v307_v5 = vcombine.high %v295_v4, %v295_v4  ;;  %s984_s16 = scalar_lea.hbm %s1067_s4, %s677_s9  ;;  %s758_s27 = sshll.u32 %s868_s25, 4  ;;  %s759_s27 = int_to_ptr.vmem [resolvable:$false] %s758_s27 }
  0x1e   : > { %s760_s7 = scalar_lea.vmem %s759_s27, 256  ;;  %p761_p1 = scmp.lt.s32.totalorder %s986_s13, %s759_s27 }
  0x1f   : > { %660 = vmatprep.subr.msk.mxu0 %vm315_vm0, %v307_v5  ;;  %679 = vmatprep.subr.msk.mxu1 %vm315_vm0, %v307_v5  ;;  %p762_p2 = scmp.lt.s32.totalorder %s760_s7, %s754_s24 }
  0x20   : > { %661 = vmatpush1.msk.msra.mxu0 %vm315_vm0, %v295_v4  ;;  %680 = vmatpush1.msk.msra.mxu1 %vm315_vm0, %v295_v4 }
  0x21   : > { %662 = vmatmul.mubr.msk.f32.vlgmr.msra.gmra.mrb[0].mxu0 %vm308_vm1, %v291_v6  ;;  %663 = vmatmul.mubr.msk.f32.vlgmr.msra.gmra.mrb[0].mxu1 %vm308_vm1, %v292_v7  ;;  %p763_p3 = por %p762_p2, %p761_p1 }
  0x23   : > { %p764_p5 = pnand %p763_p3, %p757_p0 }
  0x92   : > { %v304_v8 = vpop.permute.xlu0 %303 }
  0x96   : > { %v299_v9 = vpop.permute.xlu0 %298 }
  0xf4   : > { %v386_v10 = vpop.f32.mrb[0].mxu0  ;;  %v392_v11 = vpop.f32.mrb[0].mxu1 }
  0xf5   : > { %v393_v12 = vadd.f32 %v392_v11, %v304_v8  ;;  %v387_v13 = vadd.f32 %v386_v10, %v299_v9  ;;  %v388_v14 = vpop.f32.mrb[1].mxu0  ;;  %v394_v15 = vpop.f32.mrb[1].mxu1 }
  0xf6   : > { %v389_v16 = vadd.f32 %v388_v14, %v299_v9  ;;  %v395_v17 = vadd.f32 %v394_v15, %v304_v8 }
  0xf7   : > { %v665_v18 = vmul.f32 -1.442695, %v393_v12  ;;  %397 = vst [vmem:[%s287_s10] sm:$0x1f] %v387_v13 }
  0xf8   : > { %398 = vst [vmem:[%s287_s10 + $0x8] sm:$0x1f] %v389_v16  ;;  %v403_v19 = vcombine.high %v387_v13, %v389_v16  ;;  %v404_v20 = vcombine.low %v393_v12, %v395_v17  ;;  %v666_v21 = vmul.f32 -1.442695, %v395_v17 }
  0xf9   : > { %746 = vpow2.f32 %v665_v18 }
  0xfa   : > { %v664_v22 = vrot.slane %v403_v19, 9  ;;  %v410_v23 = vrot.slane %v404_v20, 5  ;;  %748 = vpow2.f32 %v666_v21 }
  0xfc   : > { %v411_v24 = vsel %vm407_vm4, %v664_v22, %v410_v23 }
  0xfd   : > { %413 = vst [vmem:[%s261_s12] sm:$0xff] %v411_v24 }
  0xfe   : > { %767 = shalt.err (!%p764_p5)
}
  0xff   : > { %s768_s8 = scalar_lea.hbm %s984_s16, 128  ;;  %s772_s9 = scalar_lea.hbm %s1067_s4, 256 }
 0x100   : > { %p769_p6 = scmp.ne.s32.totalorder %s984_s16, %s768_s8  ;;  %p773_p10 = scmp.lt.u32.totalorder %s984_s16, %s1067_s4 }
 0x101   : > { %p774_p11 = scmp.lt.u32.totalorder %s772_s9, %s768_s8  ;;  %p776_p13 = scmp.lt.u32.totalorder %s768_s8, %s984_s16 }
 0x102   : > { %p770_p7 = pnand %p769_p6, %p941_p4 }
 0x103   : > { %p775_p12 = por %p774_p11, %p773_p10 }
 0x104   : > { %p771_p9 = pneg %p770_p7 }
 0x105   : > { %p777_p0 = por %p776_p13, %p775_p12 }
 0x107   : > { %p778_p1 = pnand %p777_p0, %p771_p9 }
 0x109   : > { %781 = shalt.err (!%p778_p1)
}
 0x10a   : > { %681 = dma.vmem_to_hbm [thread:$0]  (%p941_p4), %s986_s13, 128, %s984_s16, %s460_s17   ;;  %v747_v25 = vpop.eup %746  ;;  %v869_v29 = vmov 1966171168   ;;  %v432_v31 = vlaneseq }
 0x10b   : > { %v749_v26 = vpop.eup %748  ;;  %v420_v27 = vadd.f32 1.0, %v747_v25  ;;  %v430_v30 = vunpack.c.l.s4 %v869_v29  ;;  %s655_s15 = sshll.u32 %s974_s29, 1  ;;  %s678_s13 = sshll.u32 %s856_s21, 5 }
 0x10c   : > { %v421_v28 = vadd.f32 1.0, %v749_v26  ;;  %v433_v33 = vshrl.u32 %v432_v31, 7  ;;  %s268_s16 = scalar_lea.vmem [#allocation4], %s655_s15  ;;  %vm447_vm5 = vcmp.lt.s32.totalorder %v432_v31, 256  ;;  %s1015_s27 = scalar_lea.hbm %s1068_s5, %s678_s13 }
 0x10d   : > { %750 = vrcp.f32 %v420_v27  ;;  %v431_v32 = vunpack.c.0.s8 %v430_v30  ;;  %s501_s17 = sshll.u32 %s268_s16, 4  ;;  %s465_s7 = scalar_lea.sflag [#allocation5], %s974_s29  ;;  %s1017_s17 = int_to_ptr.vmem [resolvable:$true] %s501_s17 }
 0x10e   : > { %752 = vrcp.f32 %v421_v28  ;;  %s782_s8 = scalar_lea.vmem %s1017_s17, 32  ;;  %s870_s21 = smov [#allocation4]  }
 0x10f   : > { %v434_v35 = vsub.s32 %v431_v32, %v433_v33  ;;  %p783_p2 = scmp.ne.s32.totalorder %s1017_s17, %s782_s8  ;;  %s786_s10 = sshll.u32 %s870_s21, 4  ;;  %s787_s10 = int_to_ptr.vmem [resolvable:$false] %s786_s10 }
 0x110   : > { %s788_s11 = scalar_lea.vmem %s787_s10, 64  ;;  %p789_p6 = scmp.lt.s32.totalorder %s1017_s17, %s787_s10 }
 0x111   : > { %p784_p3 = pnand %p783_p2, %p941_p4  ;;  %p790_p7 = scmp.lt.s32.totalorder %s788_s11, %s782_s8 }
 0x113   : > { %p785_p5 = pneg %p784_p3  ;;  %p791_p9 = por %p790_p7, %p789_p6 }
 0x115   : > { %p792_p10 = pnand %p791_p9, %p785_p5 }
 0x117   : > { %v751_v34 = vpop.eup %750 }
 0x118   : > { %v753_v36 = vpop.eup %752 }
 0x119   : > { %v428_v37 = vcombine.low %v751_v34, %v753_v36 }
 0x11b   : > { %v435_v38 = vrot.slane %v428_v37, %v434_v35 }
 0x11d   : > { %v436_v39 = vcombine.high %v435_v38, %v435_v38 }
 0x11f   : > { %v443_v40 = vrot.slane %v436_v39, %v434_v35 }
 0x121   : > { %449 = vst.msk [vmem:[%s268_s16] sm:$0x3] %vm447_vm5, %v443_v40 }
 0x122   : > { %795 = shalt.err (!%p792_p10)
}
 0x123   : > { %s796_s29 = scalar_lea.hbm %s1015_s27, 32  ;;  %s800_s14 = scalar_lea.hbm %s1068_s5, 64 }
 0x124   : > { %p797_p11 = scmp.ne.s32.totalorder %s1015_s27, %s796_s29  ;;  %p801_p0 = scmp.lt.u32.totalorder %s1015_s27, %s1068_s5 }
 0x125   : > { %p802_p1 = scmp.lt.u32.totalorder %s800_s14, %s796_s29  ;;  %p804_p3 = scmp.lt.u32.totalorder %s796_s29, %s1015_s27 }
 0x126   : > { %p798_p12 = pnand %p797_p11, %p941_p4 }
 0x127   : > { %p803_p2 = por %p802_p1, %p801_p0 }
 0x128   : > { %p799_p13 = pneg %p798_p12 }
 0x129   : > { %p805_p5 = por %p804_p3, %p803_p2 }
 0x12b   : > { %p806_p6 = pnand %p805_p5, %p799_p13 }
 0x12d   : > { %809 = shalt.err (!%p806_p6)
}
 0x12e   : > { %682 = dma.vmem_to_hbm [thread:$0]  (%p941_p4), %s1017_s17, 32, %s1015_s27, %s465_s7  }
 0x12f PF: > { %p692_p7 = scmp.ge.s32.totalorder %s864_s23, 2  ;;  %s525_s16 = sand.u32 1, %s844_s18  }
 0x130   : > { %s526_s24 = scalar_lea.sflag [#allocation3], %s525_s16 }
 0x131   : > { %p686_p9 = pnand %p692_p7, %p948_p8 }
 0x133   : > { %835 = dma.done.wait (!%p686_p9), %s526_s24, 128  }
 0x134   : > { %837 = vsyncadd (!%p686_p9), %s526_s24, 4294967168  ;;  %s535_s25 = scalar_lea.sflag [#allocation5], %s525_s16 }
 0x135   : > { %839 = dma.done.wait (!%p686_p9), %s535_s25, 32  }
 0x136   : > { %841 = vsyncadd (!%p686_p9), %s535_s25, 4294967264  ;;  %s22_s23 = sadd.s32 1, %s864_s23   ;;  %s1071_s18 = smov %s848_s19 }
 0x137   : > { %p19_p10 = scmp.ge.s32.totalorder %s22_s23, 4   ;;  %s1072_s19 = smov %s852_s20 }
 0x138   : > { %s1073_s20 = smov %s954_s6  ;;  %s1074_s21 = smov %s860_s22 }
 0x139   : > { %s1075_s22 = smov %s1077_s26  ;;  %21 = sbr.rel (!%p19_p10) target bundleno = 6 (0x6), region = 96 }
 0x140   :  { %540 = vsyncpa [#allocation3], 1 }
 0x141   :  { %542 = vsyncpa [#allocation3 + $0x1], 1 }
 0x142   :  { %543 = vsyncpa [#allocation5], 1 }
 0x143   :  { %545 = vsyncpa [#allocation5 + $0x1], 1 }

</bundles_post_ra>
